<compile_context>
chip_gen: v7x
topology: tpu7x:2x2x1
jax: 0.10.0
libtpu: 0.0.40
codegen_flags: <defaults>
</compile_context>

<pallas_src>
import math

import jax
import jax.numpy as jnp
import numpy as np
from jax.experimental import pallas as pl
from jax.experimental.pallas import tpu as pltpu


# ------------------------------ Pallas kernels ------------------------------

def _rotate_and_store(y, d_ref, b_ref, o_ref):
    """Rotate each (tm, blk) slab of f32 y by its own orthogonal block, add bias, store."""
    g, blk, _ = d_ref.shape
    for gi in range(g):                                   # static unroll (g small)
        sl = slice(gi * blk, (gi + 1) * blk)              # 128-aligned static slice
        rot = jnp.dot(y[:, sl], d_ref[gi],                # (tm,blk)@(blk,blk) f32
                      preferred_element_type=jnp.float32)
        o_ref[:, sl] = (rot + b_ref[:, sl]).astype(o_ref.dtype)


def _oft2_kernel_fullk(x_ref, wt_ref, d_ref, b_ref, o_ref):
    # Full-K tile: single base GEMM, no accumulator RMW, no K grid axis.
    xw = x_ref[...].astype(wt_ref.dtype)                  # in-kernel cast (VPU)
    y = jnp.dot(xw, wt_ref[...], preferred_element_type=jnp.float32)
    _rotate_and_store(y, d_ref, b_ref, o_ref)


def _oft2_kernel_ksplit(x_ref, wt_ref, d_ref, b_ref, o_ref, acc_ref):
    k = pl.program_id(2)

    @pl.when(k == 0)
    def _init():
        acc_ref[...] = jnp.zeros_like(acc_ref)

    acc_ref[...] += jnp.dot(x_ref[...].astype(wt_ref.dtype), wt_ref[...],
                            preferred_element_type=jnp.float32)

    @pl.when(k == pl.num_programs(2) - 1)
    def _finalize():
        _rotate_and_store(acc_ref[...], d_ref, b_ref, o_ref)


# ------------------------------ tile selection ------------------------------

def _pick_tile(total, cap, quantum):
    """Largest multiple of `quantum` that divides `total` and is <= cap, else `total`."""
    cap = min(cap, total)
    if cap >= total:
        return total
    t = (cap // quantum) * quantum
    while t >= quantum:
        if total % t == 0:
            return t
        t -= quantum
    return total


def oft2_linear_forward(x, wt, bias2d, d_blocks, *,
                        tile_m=512, tile_k=2048, target_tn=512,
                        max_k_tile=None, vmem_budget_bytes=40 * 1024 * 1024,
                        vmem_limit_bytes=None):
    """OFT2 linear forward.

    x:        (M, IN)       activations (native dtype kept in HBM; cast in kernel)
    wt:       (IN, OUT)     base weight, transposed + cast to compute dtype
    bias2d:   (1, OUT)      base bias, f32
    d_blocks: (r, blk, blk) per-block orthogonal rotations, f32
    """
    M, IN = x.shape
    IN_w, OUT = wt.shape
    r, blk, blk2 = d_blocks.shape
    assert IN_w == IN and blk == blk2 and r * blk == OUT
    assert bias2d.shape == (1, OUT)
    assert blk % 128 == 0, "OUT/r must be a multiple of 128 (lane-dense stores)"

    # Output group size: tn = g*blk, wide enough to fill the 256-wide MXU.
    g = r
    for cand in range(1, r + 1):
        if r % cand == 0 and cand * blk >= min(target_tn, r * blk):
            g = cand
            break
    tn = g * blk

    x_b = jnp.dtype(x.dtype).itemsize
    w_b = jnp.dtype(wt.dtype).itemsize
    d_b = jnp.dtype(d_blocks.dtype).itemsize
    o_b = x_b

    def footprint(tm_, tk_, ksplit):
        f = 2 * tm_ * tk_ * x_b            # x tiles (double-buffered)
        f += 2 * tk_ * tn * w_b            # W^T tiles
        f += 2 * g * blk * blk * d_b       # D group
        f += 2 * tn * 4                    # bias slice
        f += 2 * tm_ * tn * o_b            # output tiles
        if ksplit:
            f += tm_ * tn * 4              # f32 accumulator scratch
        return f

    # M tile.
    tm = _pick_tile(M, tile_m, 8)
    # v7x megacore: keep >= 2 parallel grid points when possible.
    if (M // tm) * (r // g) < 2 and tm % 16 == 0:
        tm //= 2

    # K tile: prefer eliminating the K axis entirely (no accumulator RMW).
    if max_k_tile is not None and max_k_tile >= IN:
        max_k_tile = None
    use_ksplit = False
    tk = IN
    if max_k_tile is not None or footprint(tm, IN, False) > vmem_budget_bytes:
        cap = tile_k if max_k_tile is None else min(tile_k, max_k_tile)
        tk = _pick_tile(IN, cap, 128)
        use_ksplit = tk != IN
        while (use_ksplit and footprint(tm, tk, True) > vmem_budget_bytes
               and tk > 128):
            nxt = _pick_tile(IN, tk // 2, 128)
            if nxt in (tk, IN):
                break
            tk = nxt
    # Last resort: shrink the M tile.
    while footprint(tm, tk, use_ksplit) > vmem_budget_bytes and tm > 8:
        nxt = _pick_tile(M, tm // 2, 8)
        if nxt == tm:
            break
        tm = nxt

    assert M % tm == 0 and (tm % 8 == 0 or tm == M)
    assert IN % tk == 0 and (tk % 128 == 0 or tk == IN)

    fp = footprint(tm, tk, use_ksplit)
    if vmem_limit_bytes is None and fp > 30 * 1024 * 1024:
        vmem_limit_bytes = min(60 * 1024 * 1024, fp + 8 * 1024 * 1024)

    out_shape = jax.ShapeDtypeStruct((M, OUT), x.dtype)

    if not use_ksplit:
        grid = (M // tm, r // g)
        return pl.pallas_call(
            _oft2_kernel_fullk,
            out_shape=out_shape,
            grid_spec=pltpu.PrefetchScalarGridSpec(
                num_scalar_prefetch=0,
                grid=grid,
                in_specs=[
                    pl.BlockSpec((tm, IN), lambda i, j: (i, 0)),        # x tile
                    pl.BlockSpec((IN, tn), lambda i, j: (0, j)),        # W^T group
                    pl.BlockSpec((g, blk, blk), lambda i, j: (j, 0, 0)),  # D group
                    pl.BlockSpec((1, tn), lambda i, j: (0, j)),         # bias slice
                ],
                out_specs=pl.BlockSpec((tm, tn), lambda i, j: (i, j)),
            ),
            compiler_params=pltpu.CompilerParams(
                dimension_semantics=("parallel", "parallel"),
                vmem_limit_bytes=vmem_limit_bytes,
            ),
        )(x, wt, d_blocks, bias2d)

    grid = (M // tm, r // g, IN // tk)
    return pl.pallas_call(
        _oft2_kernel_ksplit,
        out_shape=out_shape,
        grid_spec=pltpu.PrefetchScalarGridSpec(
            num_scalar_prefetch=0,
            grid=grid,
            in_specs=[
                pl.BlockSpec((tm, tk), lambda i, j, k: (i, k)),          # x tile
                pl.BlockSpec((tk, tn), lambda i, j, k: (k, j)),          # W^T tile
                pl.BlockSpec((g, blk, blk), lambda i, j, k: (j, 0, 0)),  # D group
                pl.BlockSpec((1, tn), lambda i, j, k: (0, j)),           # bias slice
            ],
            out_specs=pl.BlockSpec((tm, tn), lambda i, j, k: (i, j)),
            scratch_shapes=[pltpu.VMEM((tm, tn), jnp.float32)],
        ),
        compiler_params=pltpu.CompilerParams(
            dimension_semantics=("parallel", "parallel", "arbitrary"),
            vmem_limit_bytes=vmem_limit_bytes,
        ),
    )(x, wt, d_blocks, bias2d)


# --------------------------- parameter-setup glue ---------------------------

def find_closest_binomial(target):
    # mirrors OFT2Layer.find_closest_binomial: returns (n-1, C(n-1, 1))
    n = 2
    prev_binom = 1
    while True:
        binom_value = math.comb(n, 1)
        if binom_value > target:
            return n - 1, prev_binom
        prev_binom = binom_value
        n += 1


def cayley_batch(data):
    # mirrors OFT2Layer._cayley_batch
    b, r, c = data.shape
    skew = 0.5 * (data - jnp.swapaxes(data, 1, 2))
    eye = jnp.broadcast_to(jnp.eye(r, dtype=data.dtype), (b, r, c))
    return jnp.matmul(eye - skew, jnp.linalg.inv(eye + skew))


def prepare_oft2_linear_params(weight, bias, oft2_r, r, *,
                               compute_dtype=jnp.bfloat16):
    """One-time parameter prep: transpose/cast W, build per-block D (no dense D).

    weight: (OUT, IN) torch-style; bias: (OUT,); oft2_r: (r or 1, n, n).
    Returns (wt (IN,OUT) compute_dtype, bias2d (1,OUT) f32, d_blocks (r,blk,blk) f32).
    """
    OUT, IN = weight.shape
    assert OUT % r == 0
    blk = OUT // r

    oft2_r = jnp.asarray(oft2_r, jnp.float32)
    if oft2_r.shape[0] == 1 and r > 1:          # block_share: one shared block
        oft2_r = jnp.broadcast_to(oft2_r, (r,) + oft2_r.shape[1:])

    orth = cayley_batch(oft2_r)                  # (r, n, n)
    n = orth.shape[-1]
    if n != blk:
        # PEFT's _block_diagonal pads: block in top-left, identity bottom-right,
        # zeros elsewhere (this construction reproduces exactly that).
        padded = jnp.broadcast_to(jnp.eye(blk, dtype=orth.dtype), (r, blk, blk))
        orth = padded.at[:, :n, :n].set(orth)

    wt = jnp.asarray(weight, jnp.float32).T.astype(compute_dtype)   # (IN, OUT)
    bias2d = jnp.asarray(bias, jnp.float32).reshape(1, OUT)         # f32 epilogue
    d_blocks = orth.astype(jnp.float32)          # rotation kept in f32 (tiny GEMM)
    return wt, bias2d, d_blocks


# ----------------------------------- main ------------------------------------

if __name__ == "__main__":
    key = jax.random.PRNGKey(0)
    k_x, k_w, k_b, k_r = jax.random.split(key, 4)

    # Small but tile-aligned Linear base layer:
    #   in_features=256, out_features=256, rank r=2 -> block size 128.
    B, IN, OUT, r = 64, 256, 256, 2
    blk = OUT // r

    x = jax.random.normal(k_x, (B, IN), jnp.float32)
    weight = jax.random.normal(k_w, (OUT, IN), jnp.float32) * 0.1   # torch (out, in)
    bias = jax.random.normal(k_b, (OUT,), jnp.float32) * 0.1

    # Adapter parameters (init_weights=False -> kaiming_uniform(a=sqrt(5))).
    compound_n, _ = find_closest_binomial(blk)
    fan_in = compound_n * compound_n
    gain = math.sqrt(2.0 / (1.0 + 5.0))
    bound = math.sqrt(3.0) * gain / math.sqrt(fan_in)
    oft2_r = jax.random.uniform(k_r, (r, compound_n, compound_n), jnp.float32,
                                -bound, bound)

    # ---- pure-JAX reference of the module's exact forward sequence --------
    orth_ref = cayley_batch(oft2_r)
    dense_D = jax.scipy.linalg.block_diag(
        *[orth_ref[i] for i in range(r)])[:OUT, :OUT]
    hi = jax.lax.Precision.HIGHEST
    ref = jnp.dot(x, weight.T, precision=hi) + bias
    ref = ref - bias
    ref = jnp.dot(ref, dense_D, precision=hi)
    ref = ref + bias
    ref = np.asarray(jax.block_until_ready(ref))

    # ---- Pallas kernel, f32 operands, full-K path (exact) -------------------
    wt32, b2d, d32 = prepare_oft2_linear_params(
        weight, bias, oft2_r, r, compute_dtype=jnp.float32)
    out_f32 = jax.block_until_ready(oft2_linear_forward(x, wt32, b2d, d32))
    np.testing.assert_allclose(np.asarray(out_f32), ref, rtol=5e-4, atol=5e-4)

    # ---- Pallas kernel, f32 operands, forced K-split path (exact) -----------
    out_ks = jax.block_until_ready(
        oft2_linear_forward(x, wt32, b2d, d32, max_k_tile=128))
    np.testing.assert_allclose(np.asarray(out_ks), ref, rtol=5e-4, atol=5e-4)

    # ---- Pallas kernel, bf16 base-GEMM operands (MXU fast path) -------------
    wt16, b2d16, d16 = prepare_oft2_linear_params(
        weight, bias, oft2_r, r, compute_dtype=jnp.bfloat16)
    out_bf16 = jax.block_until_ready(oft2_linear_forward(x, wt16, b2d16, d16))
    np.testing.assert_allclose(np.asarray(out_bf16), ref, rtol=2e-2, atol=5e-2)

    print("KERNEL_OK")
</pallas_src>

<mosaic_0001>
module attributes {stable_mosaic.version = 11 : i64} {
  func.func @_oft2_kernel_fullk(%arg0: i32, %arg1: i32, %arg2: memref<32x256xf32, #tpu.memory_space<vmem>>, %arg3: memref<256x256xf32, #tpu.memory_space<vmem>>, %arg4: memref<2x128x128xf32, #tpu.memory_space<vmem>>, %arg5: memref<1x256xf32, #tpu.memory_space<vmem>>, %arg6: memref<32x256xf32, #tpu.memory_space<vmem>>) attributes {dimension_semantics = [#tpu.dimension_semantics<parallel>, #tpu.dimension_semantics<parallel>], iteration_bounds = array<i64: 2, 1>, scalar_prefetch = 0 : i64, scratch_operands = 0 : i64, tpu.core_type = #tpu.core_type<tc>, window_params = [{transform_indices = @transform_0, window_bounds = array<i64: 32, 256>}, {transform_indices = @transform_1, window_bounds = array<i64: 256, 256>}, {transform_indices = @transform_2, window_bounds = array<i64: 2, 128, 128>}, {transform_indices = @transform_3, window_bounds = array<i64: 1, 256>}, {transform_indices = @transform_4, window_bounds = array<i64: 32, 256>}]} {
    %c0 = arith.constant 0 : index
    %c0_0 = arith.constant 0 : index
    %0 = vector.load %arg2[%c0, %c0_0] : memref<32x256xf32, #tpu.memory_space<vmem>>, vector<32x256xf32>
    %c0_1 = arith.constant 0 : index
    %c0_2 = arith.constant 0 : index
    %1 = vector.load %arg3[%c0_1, %c0_2] : memref<256x256xf32, #tpu.memory_space<vmem>>, vector<256x256xf32>
    %cst = arith.constant dense<0.000000e+00> : vector<32x256xf32>
    %2 = tpu.matmul %0, %1, %cst {dimension_numbers = #tpu.dot_dimension_numbers<[1], [0], [0], [1], [0, 0, 1, 1], [], []>} : vector<32x256xf32>, vector<256x256xf32>, vector<32x256xf32> -> vector<32x256xf32>
    %3 = vector.extract_strided_slice %2 {offsets = [0, 0], sizes = [32, 128], strides = [1, 1]} : vector<32x256xf32> to vector<32x128xf32>
    %c0_3 = arith.constant 0 : index
    %c0_4 = arith.constant 0 : index
    %c0_5 = arith.constant 0 : index
    %4 = vector.load %arg4[%c0_3, %c0_4, %c0_5] : memref<2x128x128xf32, #tpu.memory_space<vmem>>, vector<1x128x128xf32>
    %5 = vector.shape_cast %4 : vector<1x128x128xf32> to vector<128x128xf32>
    %cst_6 = arith.constant dense<0.000000e+00> : vector<32x128xf32>
    %6 = tpu.matmul %3, %5, %cst_6 {dimension_numbers = #tpu.dot_dimension_numbers<[1], [0], [0], [1], [0, 0, 1, 1], [], []>} : vector<32x128xf32>, vector<128x128xf32>, vector<32x128xf32> -> vector<32x128xf32>
    %c0_7 = arith.constant 0 : index
    %c0_8 = arith.constant 0 : index
    %7 = vector.load %arg5[%c0_7, %c0_8] : memref<1x256xf32, #tpu.memory_space<vmem>>, vector<1x128xf32>
    %8 = vector.broadcast %7 : vector<1x128xf32> to vector<32x128xf32>
    %9 = arith.addf %6, %8 : vector<32x128xf32>
    %c0_9 = arith.constant 0 : index
    %c0_10 = arith.constant 0 : index
    %10 = vector.load %arg6[%c0_9, %c0_10] : memref<32x256xf32, #tpu.memory_space<vmem>>, vector<32x128xf32>
    tpu.vector_store %arg6[%c0_9, %c0_10], %9 {strides = array<i32>} : memref<32x256xf32, #tpu.memory_space<vmem>>, vector<32x128xf32>,
    %11 = vector.extract_strided_slice %2 {offsets = [0, 128], sizes = [32, 128], strides = [1, 1]} : vector<32x256xf32> to vector<32x128xf32>
    %c1 = arith.constant 1 : index
    %c0_11 = arith.constant 0 : index
    %c0_12 = arith.constant 0 : index
    %12 = vector.load %arg4[%c1, %c0_11, %c0_12] : memref<2x128x128xf32, #tpu.memory_space<vmem>>, vector<1x128x128xf32>
    %13 = vector.shape_cast %12 : vector<1x128x128xf32> to vector<128x128xf32>
    %cst_13 = arith.constant dense<0.000000e+00> : vector<32x128xf32>
    %14 = tpu.matmul %11, %13, %cst_13 {dimension_numbers = #tpu.dot_dimension_numbers<[1], [0], [0], [1], [0, 0, 1, 1], [], []>} : vector<32x128xf32>, vector<128x128xf32>, vector<32x128xf32> -> vector<32x128xf32>
    %c0_14 = arith.constant 0 : index
    %c128 = arith.constant 128 : index
    %15 = vector.load %arg5[%c0_14, %c128] : memref<1x256xf32, #tpu.memory_space<vmem>>, vector<1x128xf32>
    %16 = vector.broadcast %15 : vector<1x128xf32> to vector<32x128xf32>
    %17 = arith.addf %14, %16 : vector<32x128xf32>
    %c0_15 = arith.constant 0 : index
    %c128_16 = arith.constant 128 : index
    %18 = vector.load %arg6[%c0_15, %c128_16] : memref<32x256xf32, #tpu.memory_space<vmem>>, vector<32x128xf32>
    tpu.vector_store %arg6[%c0_15, %c128_16], %17 {strides = array<i32>} : memref<32x256xf32, #tpu.memory_space<vmem>>, vector<32x128xf32>,
    return
  }
  func.func @transform_0(%arg0: i32, %arg1: i32) -> (i32, i32) {
    %c0_i32 = arith.constant 0 : i32
    %c0_i32_0 = arith.constant 0 : i32
    return %arg0, %c0_i32 : i32, i32
  }
  func.func @transform_1(%arg0: i32, %arg1: i32) -> (i32, i32) {
    %c0_i32 = arith.constant 0 : i32
    %c0_i32_0 = arith.constant 0 : i32
    return %c0_i32, %arg1 : i32, i32
  }
  func.func @transform_2(%arg0: i32, %arg1: i32) -> (i32, i32, i32) {
    %c0_i32 = arith.constant 0 : i32
    %c0_i32_0 = arith.constant 0 : i32
    %c0_i32_1 = arith.constant 0 : i32
    return %arg1, %c0_i32, %c0_i32_0 : i32, i32, i32
  }
  func.func @transform_3(%arg0: i32, %arg1: i32) -> (i32, i32) {
    %c0_i32 = arith.constant 0 : i32
    %c0_i32_0 = arith.constant 0 : i32
    return %c0_i32, %arg1 : i32, i32
  }
  func.func @transform_4(%arg0: i32, %arg1: i32) -> (i32, i32) {
    %c0_i32 = arith.constant 0 : i32
    return %arg0, %arg1 : i32, i32
  }
}

</mosaic_0001>

<bundles_post_ra>
// kernel: tpu_custom_call.1
= control target key start
LH: loop header
LB: loop body
LE: loop exit
PB: predicated region body
PF: predicated region fallthrough
CT: control target
= control target key end

     0   :  { %9 = vsyncpa [#allocation3], 0  ;;  %s1674_s0 = inlined_call_operand.hbm [shape: f32[64,256], index: 0, kind: input, shape index: {}]   ;;  %s1675_s1 = inlined_call_operand.hbm [shape: f32[256,256], index: 1, kind: input, shape index: {}]   ;;  %s1676_s2 = inlined_call_operand.hbm [shape: f32[2,128,128], index: 2, kind: input, shape index: {}]   ;;  %s1677_s3 = inlined_call_operand.vmem [shape: f32[1,256], index: 3, kind: input, shape index: {}]   ;;  %s1678_s4 = inlined_call_operand.hbm [shape: f32[64,256], index: 4, kind: output, shape index: {}]  }
   0x1   :  { %11 = vsyncpa [#allocation3 + $0x1], 0 }
   0x2   :  { %12 = vsyncpa [#allocation6], 0 }
   0x3   :  { %13 = vsyncpa [#allocation4], 0 }
   0x4   :  { %15 = vsyncpa [#allocation4 + $0x1], 0  ;;  %s1393_s15 = smov 0   ;;  %s1395_s16 = smov 0  }
   0x5   :  { %s1397_s17 = smov 0   ;;  %s1399_s18 = smov 0  }
   0x6   :  { %s1401_s19 = smov 0   ;;  %s1403_s20 = smov 0  }
   0x7 LB: > { %s823_s21 = sadd.s32 4294967295, %s1356_s20   ;;  %s824_s22 = sadd.s32 4294967294, %s1356_s20   ;;  %s1356_s20 = sphi %s1403_s20, %s21_s20   ;;  %s1352_s19 = sphi %s1401_s19, %s1700_s19   ;;  %s1348_s18 = sphi %s1399_s18, %s1699_s18   ;;  %s1344_s17 = sphi %s1397_s17, %s1698_s17   ;;  %s1340_s16 = sphi %s1395_s16, %s1697_s16   ;;  %s1336_s15 = sphi %s1393_s15, %s1696_s15  }
   0x8   : > { %p53_p0 = scmp.ne.s32.totalorder %s1340_s16, %s1336_s15  ;;  %p1427_p1 = scmp.eq.s32.totalorder %s823_s21, 0 }
   0x9   : > { %p1431_p2 = scmp.eq.s32.totalorder %s823_s21, 1  ;;  %p163_p3 = scmp.eq.s32.totalorder %s824_s22, 1 }
   0xa   : > { %s1683_s23 = scalar_select %p1427_p1, 1, 0 }
   0xb   : > { %p1437_p4 = por %p1427_p1, %p53_p0  ;;  %p825_p5 = scmp.ge.s32.totalorder %s1356_s20, 1 }
   0xc   : > { %p1442_p6 = por %p163_p3, %p53_p0  ;;  %p170_p7 = scmp.lt.s32.totalorder %s1356_s20, 3 }
   0xd   : > { %s1685_s25 = scalar_select %p1437_p4, 1, 0 }
   0xe   : > { %s1686_s26 = scalar_select %p1442_p6, 1, 0 }
   0xf   : > { %p1447_p8 = pnand %p825_p5, %p170_p7  ;;  %s1358_s28 = smov [#allocation5]  }
  0x10   : > { %s185_s29 = sshll.u32 %s1358_s28, 4  ;;  %s1359_s5 = smov [#allocation7]   ;;  %s1451_s29 = int_to_ptr.vmem [resolvable:$true] %s185_s29 }
  0x11   : > { %p1107_p9 = pneg %p1447_p8  ;;  %s202_s6 = sshll.u32 %s1359_s5, 4  ;;  %s1462_s6 = int_to_ptr.vmem [resolvable:$true] %s202_s6 }
  0x12   : > { %s1184_s9 = scalar_lea.hbm %s1675_s1, 8192 }
  0x13   : > { %p1458_p11 = pnand %p1107_p9, %p1427_p1  ;;  %p1185_p12 = scmp.ne.s32.totalorder %s1675_s1, %s1184_s9 }
  0x14   : > { %p1191_p5 = scmp.lt.u32.totalorder %s1184_s9, %s1675_s1 }
  0x15   : > { %p1186_p13 = pneg %p1458_p11 }
  0x17   : > { %p1187_p0 = pnand %p1186_p13, %p1185_p12 }
  0x19   : > { %p1188_p3 = pneg %p1187_p0 }
  0x1b   : > { %p1193_p7 = pnand %p1191_p5, %p1188_p3 }
  0x1d   : > { %1196 = shalt.err (!%p1193_p7)
}
  0x1e   : > { %s1197_s14 = scalar_lea.vmem %s1451_s29, 8192  ;;  %p1205_p1 = scmp.lt.s32.totalorder %s1451_s29, %s1451_s29 }
  0x1f   : > { %p1198_p9 = scmp.ne.s32.totalorder %s1451_s29, %s1197_s14  ;;  %p1206_p12 = scmp.lt.s32.totalorder %s1197_s14, %s1197_s14 }
  0x21   : > { %p1200_p10 = pnand %p1198_p9, %p1186_p13  ;;  %p1207_p0 = por %p1206_p12, %p1205_p1 }
  0x23   : > { %p1201_p6 = pneg %p1200_p10 }
  0x25   : > { %p1208_p4 = pnand %p1207_p0, %p1201_p6 }
  0x27   : > { %1211 = shalt.err (!%p1208_p4)
}
  0x28   : > { %s1360_s21 = smov 256   ;;  %s1361_s22 = smov 16  }
  0x29   : > { %1110 = dma.hbm_to_vmem [thread:$0]  (!%p1458_p11), %s1675_s1, 8192, %s1451_s29, [#allocation6], %s1360_s21, %s1360_s21, %s1361_s22  }
  0x2a   : > { %s1212_s9 = scalar_lea.hbm %s1676_s2, 4096 }
  0x2b   : > { %p1213_p1 = scmp.ne.s32.totalorder %s1676_s2, %s1212_s9  ;;  %p1219_p10 = scmp.lt.u32.totalorder %s1212_s9, %s1676_s2 }
  0x2d   : > { %p1215_p4 = pnand %p1213_p1, %p1186_p13 }
  0x2f   : > { %p1216_p6 = pneg %p1215_p4 }
  0x31   : > { %p1221_p3 = pnand %p1219_p10, %p1216_p6 }
  0x33   : > { %1224 = shalt.err (!%p1221_p3)
}
  0x34   : > { %s1225_s29 = scalar_lea.vmem %s1462_s6, 4096  ;;  %p1233_p12 = scmp.lt.s32.totalorder %s1462_s6, %s1462_s6 }
  0x35   : > { %p1226_p5 = scmp.ne.s32.totalorder %s1462_s6, %s1225_s29  ;;  %p1234_p0 = scmp.lt.s32.totalorder %s1225_s29, %s1225_s29 }
  0x37   : > { %p1228_p7 = pnand %p1226_p5, %p1186_p13  ;;  %p1235_p1 = por %p1234_p0, %p1233_p12 }
  0x39   : > { %p1229_p9 = pneg %p1228_p7 }
  0x3b   : > { %p1236_p4 = pnand %p1235_p1, %p1229_p9 }
  0x3d   : > { %1239 = shalt.err (!%p1236_p4)
}
  0x3e   : > { %s1362_s14 = smov 128   ;;  %s1363_s28 = smov 8  }
  0x3f   : > { %1113 = dma.hbm_to_vmem [thread:$0]  (!%p1458_p11), %s1676_s2, 4096, %s1462_s6, [#allocation6], %s1362_s14, %s1362_s14, %s1363_s28  }
  0x40   : > { %s33_s8 = sadd.s32 1, %s1352_s19  ;;  %s40_s9 = sadd.s32 1, %s1344_s17 }
  0x41   : > { %p35_p13 = scmp.ge.s32.totalorder %s33_s8, 2  ;;  %p47_p6 = scmp.ne.s32.totalorder %s1344_s17, %s1340_s16 }
  0x42   : > { %p48_p10 = scmp.eq.s32.totalorder %s1356_s20, 0  ;;  %p1124_p3 = scmp.lt.s32.totalorder %s1356_s20, 2 }
  0x43   : > { %s1702_s8 = smov (%p35_p13, %s33_s8), 0  ;;  %p1529_p7 = por %p1431_p2, %p47_p6 }
  0x44   : > { %p49_p5 = por %p48_p10, %p47_p6  ;;  %s37_s30 = ssub.s32 %s1352_s19, %s1702_s8 }
  0x45   : > { %s1689_s10 = scalar_select %p1529_p7, 1, 0 }
  0x46   : > { %s224_s11 = sand.u32 1, %s1344_s17   ;;  %p38_p9 = scmp.eq.s32.totalorder %s37_s30, 0 }
  0x47   : > { %s830_s6 = sshll.u32 %s224_s11, 6  ;;  %s848_s12 = sshll.u32 %s1352_s19, 10 }
  0x48   : > { %s1538_s13 = scalar_select %p38_p9, %s1344_s17, %s40_s9  }
  0x49   : > { %s1543_s28 = scalar_lea.hbm %s1674_s0, %s848_s12  ;;  %s228_s24 = scalar_lea.vmem [#allocation2], %s830_s6 }
  0x4a   : > { %s236_s5 = sshll.u32 %s228_s24, 4  ;;  %p1547_p2 = pnand %p1124_p3, %p49_p5  ;;  %s1551_s5 = int_to_ptr.vmem [resolvable:$true] %s236_s5 }
  0x4b   : > { %s1553_s9 = scalar_lea.sflag [#allocation3], %s224_s11  ;;  %s1240_s30 = scalar_lea.hbm %s1543_s28, 1024 }
  0x4c   : > { %p1241_p11 = scmp.ne.s32.totalorder %s1543_s28, %s1240_s30  ;;  %p1242_p12 = pneg %p1547_p2 }
  0x4d   : > { %s1245_s29 = scalar_lea.hbm %s1674_s0, 2048  ;;  %p1246_p4 = scmp.lt.u32.totalorder %s1543_s28, %s1674_s0 }
  0x4e   : > { %p1243_p0 = pnand %p1242_p12, %p1241_p11  ;;  %p1247_p13 = scmp.lt.u32.totalorder %s1245_s29, %s1240_s30 }
  0x4f   : > { %p1249_p10 = scmp.lt.u32.totalorder %s1240_s30, %s1543_s28 }
  0x50   : > { %p1244_p1 = pneg %p1243_p0  ;;  %p1248_p6 = por %p1247_p13, %p1246_p4 }
  0x52   : > { %p1250_p3 = por %p1249_p10, %p1248_p6 }
  0x54   : > { %p1251_p5 = pnand %p1250_p3, %p1244_p1 }
  0x56   : > { %1254 = shalt.err (!%p1251_p5)
}
  0x57   : > { %s1255_s11 = scalar_lea.vmem %s1551_s5, 1024  ;;  %s1364_s6 = smov [#allocation2]  }
  0x58   : > { %p1256_p9 = scmp.ne.s32.totalorder %s1551_s5, %s1255_s11  ;;  %s1260_s12 = sshll.u32 %s1364_s6, 4  ;;  %s1261_s12 = int_to_ptr.vmem [resolvable:$false] %s1260_s12 }
  0x59   : > { %s1262_s14 = scalar_lea.vmem %s1261_s12, 2048  ;;  %p1263_p7 = scmp.lt.s32.totalorder %s1551_s5, %s1261_s12 }
  0x5a   : > { %p1258_p11 = pnand %p1256_p9, %p1242_p12  ;;  %p1264_p4 = scmp.lt.s32.totalorder %s1262_s14, %s1255_s11 }
  0x5c   : > { %p1259_p0 = pneg %p1258_p11  ;;  %p1265_p13 = por %p1264_p4, %p1263_p7 }
  0x5e   : > { %p1266_p6 = pnand %p1265_p13, %p1259_p0 }
  0x60   : > { %1269 = shalt.err (!%p1266_p6)
}
  0x61   : > { %1117 = dma.hbm_to_vmem [thread:$0]  (!%p1547_p2), %s1543_s28, 1024, %s1551_s5, %s1553_s9, %s1360_s21, %s1360_s21, %s1361_s22  }
  0x62   : > { %248 = sbr.rel (%p1447_p8) target bundleno = 658 (0x292), region = 36  ;;  %s1587_s30 = sand.u32 (!%p1447_p8), 1, %s1340_s16  }
  0x63   : > { %s835_s29 = sshll.u32 (!%p1447_p8), %s1587_s30, 6  ;;  %s251_s24 = scalar_lea.sflag (!%p1447_p8), [#allocation3], %s1587_s30 }
  0x64   : > { %s1593_s7 = scalar_lea.vmem (!%p1447_p8), [#allocation2], %s835_s29  ;;  %p1691_p7 = scmp.ne.s32.totalorder (!%p1447_p8), %s1685_s25, 0 }
  0x69   : > { %1323 = dma.done.wait (%p1691_p7), %s251_s24, 1024  }
  0x6a   : > { %1325 = vsyncadd (%p1691_p7), %s251_s24, 4294966272  ;;  %p1692_p2 = scmp.ne.s32.totalorder %s1683_s23, 0 }
  0x6c   : > { %1327 = dma.done.wait (%p1692_p2), [#allocation6], 12288  }
  0x6d   : > { %1329 = vsyncadd (%p1692_p2), [#allocation6], 4294955008  ;;  %v310_v0 = vld [vmem:[#allocation5 + $0x8] sm:$0xff]  ;;  %v312_v1 = vld [vmem:[#allocation5 + $0x18] sm:$0xff]  ;;  %s290_s27 = scalar_lea.vmem [#allocation8], %s835_s29  ;;  %s850_s5 = sshll.u32 %s1348_s18, 10 }
  0x6e   : > { %v309_v2 = vld [vmem:[#allocation5] sm:$0xff]  ;;  %v967_v3 = vpack.c.bf16 %v312_v1, %v310_v0  ;;  %v311_v4 = vld [vmem:[#allocation5 + $0x10] sm:$0xff]  ;;  %v314_v5 = vld [vmem:[#allocation5 + $0x28] sm:$0xff]  ;;  %s704_s28 = sshll.u32 %s290_s27, 4  ;;  %s1625_s6 = scalar_lea.hbm %s1678_s4, %s850_s5  ;;  %s1620_s28 = int_to_ptr.vmem [resolvable:$true] %s704_s28 }
  0x6f   : > { %v316_v6 = vld [vmem:[#allocation5 + $0x38] sm:$0xff]  ;;  %v969_v7 = vpack.c.bf16 %v311_v4, %v309_v2  ;;  %v313_v9 = vld [vmem:[#allocation5 + $0x20] sm:$0xff]  ;;  %v315_v10 = vld [vmem:[#allocation5 + $0x30] sm:$0xff]  ;;  %s688_s12 = scalar_lea.sflag [#allocation4], %s1587_s30  ;;  %s1270_s18 = scalar_lea.vmem %s1620_s28, 1024 }
  0x70   : > { %v971_v8 = vpack.c.bf16 %v316_v6, %v314_v5  ;;  %v318_v11 = vld [vmem:[#allocation5 + $0x48] sm:$0xff]  ;;  %968 = vmatprep.subr.bf16.mxu0 %v967_v3  ;;  %v320_v12 = vld [vmem:[#allocation5 + $0x58] sm:$0xff]  ;;  %v973_v13 = vpack.c.bf16 %v315_v10, %v313_v9  ;;  %v317_v15 = vld [vmem:[#allocation5 + $0x40] sm:$0xff]  ;;  %p1271_p8 = scmp.ne.s32.totalorder %s1620_s28, %s1270_s18  ;;  %p1693_p12 = scmp.ne.s32.totalorder %s1689_s10, 0 }
  0x71   : > { %970 = vmatpush1.bf16.msra.mxu0 %v969_v7  ;;  %v975_v14 = vpack.c.bf16 %v320_v12, %v318_v11  ;;  %v319_v16 = vld [vmem:[#allocation5 + $0x50] sm:$0xff]  ;;  %v322_v17 = vld [vmem:[#allocation5 + $0x68] sm:$0xff]  ;;  %v324_v18 = vld [vmem:[#allocation5 + $0x78] sm:$0xff]  ;;  %s1365_s14 = smov [#allocation8]  }
  0x72   : > { %972 = vmatprep.subr.bf16.mxu0 %v971_v8  ;;  %v977_v19 = vpack.c.bf16 %v319_v16, %v317_v15  ;;  %v979_v20 = vpack.c.bf16 %v324_v18, %v322_v17  ;;  %v321_v21 = vld [vmem:[#allocation5 + $0x60] sm:$0xff]  ;;  %v323_v22 = vld [vmem:[#allocation5 + $0x70] sm:$0xff]  ;;  %v326_v23 = vld [vmem:[#allocation5 + $0x88] sm:$0xff]  ;;  %p1272_p1 = pnand %p1271_p8, %p1693_p12  ;;  %s1274_s29 = sshll.u32 %s1365_s14, 4  ;;  %s1275_s29 = int_to_ptr.vmem [resolvable:$false] %s1274_s29 }
  0x73   : > { %v328_v24 = vld [vmem:[#allocation5 + $0x98] sm:$0xff]  ;;  %v981_v25 = vpack.c.bf16 %v323_v22, %v321_v21  ;;  %v325_v27 = vld [vmem:[#allocation5 + $0x80] sm:$0xff]  ;;  %v327_v28 = vld [vmem:[#allocation5 + $0x90] sm:$0xff]  ;;  %s1276_s24 = scalar_lea.vmem %s1275_s29, 2048  ;;  %p1277_p3 = scmp.lt.s32.totalorder %s1620_s28, %s1275_s29 }
  0x74   : > { %v983_v26 = vpack.c.bf16 %v328_v24, %v326_v23  ;;  %v330_v29 = vld [vmem:[#allocation5 + $0xa8] sm:$0xff]  ;;  %v332_v30 = vld [vmem:[#allocation5 + $0xb8] sm:$0xff]  ;;  %v985_v31 = vpack.c.bf16 %v327_v28, %v325_v27  ;;  %v329_v33 = vld [vmem:[#allocation5 + $0xa0] sm:$0xff]  ;;  %p1273_p10 = pneg %p1272_p1  ;;  %p1278_p5 = scmp.lt.s32.totalorder %s1276_s24, %s1270_s18 }
  0x75   : > { %974 = vmatpush1.bf16.msra.mxu0 %v973_v13  ;;  %v987_v32 = vpack.c.bf16 %v332_v30, %v330_v29  ;;  %v331_v34 = vld [vmem:[#allocation5 + $0xb0] sm:$0xff]  ;;  %v334_v35 = vld [vmem:[#allocation5 + $0xc8] sm:$0xff]  ;;  %v336_v36 = vld [vmem:[#allocation5 + $0xd8] sm:$0xff] }
  0x76   : > { %976 = vmatprep.subr.bf16.mxu0 %v975_v14  ;;  %v989_v37 = vpack.c.bf16 %v331_v34, %v329_v33  ;;  %v991_v38 = vpack.c.bf16 %v336_v36, %v334_v35  ;;  %v333_v39 = vld [vmem:[#allocation5 + $0xc0] sm:$0xff]  ;;  %v335_v40 = vld [vmem:[#allocation5 + $0xd0] sm:$0xff]  ;;  %v302_v41 = vld [vmem:[%s1593_s7 + $0x8] sm:$0xff]  ;;  %p1279_p9 = por %p1278_p5, %p1277_p3 }
  0x77   : > { %v338_v42 = vld [vmem:[#allocation5 + $0xe8] sm:$0xff]  ;;  %v340_v43 = vld [vmem:[#allocation5 + $0xf8] sm:$0xff]  ;;  %437 = vmatprep.mubr.f32.mxu0 %v302_v41  ;;  %v337_v44 = vld [vmem:[#allocation5 + $0xe0] sm:$0xff]  ;;  %v993_v45 = vpack.c.bf16 %v335_v40, %v333_v39 }
  0x78   : > { %v462_v46 = vld [vmem:[#allocation7] sm:$0xff]  ;;  %v463_v47 = vld [vmem:[#allocation7 + $0x8] sm:$0xff]  ;;  %v464_v48 = vld [vmem:[#allocation7 + $0x10] sm:$0xff]  ;;  %v995_v49 = vpack.c.bf16 %v340_v43, %v338_v42  ;;  %p1280_p11 = pnand %p1279_p9, %p1273_p10 }
  0x79   : > { %978 = vmatpush1.bf16.msra.mxu0 %v977_v19  ;;  %v339_v50 = vld [vmem:[#allocation5 + $0xf0] sm:$0xff]  ;;  %v342_v51 = vld [vmem:[#allocation5 + $0x108] sm:$0xff]  ;;  %v1031_v52 = vpack.c.bf16 %v463_v47, %v462_v46  ;;  %v465_v53 = vld [vmem:[#allocation7 + $0x18] sm:$0xff] }
  0x7a   : > { %980 = vmatprep.subr.bf16.mxu0 %v979_v20  ;;  %v344_v54 = vld [vmem:[#allocation5 + $0x118] sm:$0xff]  ;;  %v1035_v55 = vpack.c.bf16 %v465_v53, %v464_v48  ;;  %v466_v56 = vld [vmem:[#allocation7 + $0x20] sm:$0xff]  ;;  %v467_v57 = vld [vmem:[#allocation7 + $0x28] sm:$0xff]  ;;  %v997_v58 = vpack.c.bf16 %v339_v50, %v337_v44 }
  0x7b   : > { %1032 = vmatprep.subr.bf16.mxu1 %v1031_v52  ;;  %v999_v59 = vpack.c.bf16 %v344_v54, %v342_v51  ;;  %v341_v60 = vld [vmem:[#allocation5 + $0x100] sm:$0xff]  ;;  %v343_v61 = vld [vmem:[#allocation5 + $0x110] sm:$0xff]  ;;  %v346_v62 = vld [vmem:[#allocation5 + $0x128] sm:$0xff]  ;;  %v1039_v63 = vpack.c.bf16 %v467_v57, %v466_v56 }
  0x7c   : > { %1034 = vmatpush3.bf16.msra.mxu1 %v1031_v52  ;;  %v348_v0 = vld [vmem:[#allocation5 + $0x138] sm:$0xff]  ;;  %v468_v1 = vld [vmem:[#allocation7 + $0x30] sm:$0xff]  ;;  %v1001_v3 = vpack.c.bf16 %v343_v61, %v341_v60  ;;  %v345_v5 = vld [vmem:[#allocation5 + $0x120] sm:$0xff] }
  0x7d   : > { %982 = vmatpush1.bf16.msra.mxu0 %v981_v25  ;;  %1036 = vmatprep.subr.bf16.mxu1 %v1035_v55  ;;  %v469_v2 = vld [vmem:[#allocation7 + $0x38] sm:$0xff]  ;;  %v1003_v4 = vpack.c.bf16 %v348_v0, %v346_v62  ;;  %v347_v6 = vld [vmem:[#allocation5 + $0x130] sm:$0xff]  ;;  %v350_v7 = vld [vmem:[#allocation5 + $0x148] sm:$0xff] }
  0x7e   : > { %984 = vmatprep.subr.bf16.mxu0 %v983_v26  ;;  %v1043_v8 = vpack.c.bf16 %v469_v2, %v468_v1  ;;  %v352_v9 = vld [vmem:[#allocation5 + $0x158] sm:$0xff]  ;;  %v470_v10 = vld [vmem:[#allocation7 + $0x40] sm:$0xff]  ;;  %v471_v11 = vld [vmem:[#allocation7 + $0x48] sm:$0xff]  ;;  %v1005_v12 = vpack.c.bf16 %v347_v6, %v345_v5 }
  0x7f   : > { %v1007_v13 = vpack.c.bf16 %v352_v9, %v350_v7  ;;  %v349_v14 = vld [vmem:[#allocation5 + $0x140] sm:$0xff]  ;;  %v351_v15 = vld [vmem:[#allocation5 + $0x150] sm:$0xff]  ;;  %v354_v16 = vld [vmem:[#allocation5 + $0x168] sm:$0xff]  ;;  %v1047_v17 = vpack.c.bf16 %v471_v11, %v470_v10 }
  0x80   : > { %1038 = vmatpush3.bf16.msra.mxu1 %v1035_v55  ;;  %v356_v18 = vld [vmem:[#allocation5 + $0x178] sm:$0xff]  ;;  %v472_v19 = vld [vmem:[#allocation7 + $0x50] sm:$0xff]  ;;  %v1009_v21 = vpack.c.bf16 %v351_v15, %v349_v14  ;;  %v353_v23 = vld [vmem:[#allocation5 + $0x160] sm:$0xff] }
  0x81   : > { %986 = vmatpush1.bf16.msra.mxu0 %v985_v31  ;;  %1040 = vmatprep.subr.bf16.mxu1 %v1039_v63  ;;  %v473_v20 = vld [vmem:[#allocation7 + $0x58] sm:$0xff]  ;;  %v1011_v22 = vpack.c.bf16 %v356_v18, %v354_v16  ;;  %v355_v24 = vld [vmem:[#allocation5 + $0x170] sm:$0xff]  ;;  %v358_v25 = vld [vmem:[#allocation5 + $0x188] sm:$0xff] }
  0x82   : > { %988 = vmatprep.subr.bf16.mxu0 %v987_v32  ;;  %v1051_v26 = vpack.c.bf16 %v473_v20, %v472_v19  ;;  %v360_v27 = vld [vmem:[#allocation5 + $0x198] sm:$0xff]  ;;  %v474_v28 = vld [vmem:[#allocation7 + $0x60] sm:$0xff]  ;;  %v475_v29 = vld [vmem:[#allocation7 + $0x68] sm:$0xff]  ;;  %v1013_v30 = vpack.c.bf16 %v355_v24, %v353_v23 }
  0x83   : > { %v1015_v31 = vpack.c.bf16 %v360_v27, %v358_v25  ;;  %v357_v32 = vld [vmem:[#allocation5 + $0x180] sm:$0xff]  ;;  %v359_v33 = vld [vmem:[#allocation5 + $0x190] sm:$0xff]  ;;  %v1055_v34 = vpack.c.bf16 %v475_v29, %v474_v28  ;;  %v362_v35 = vld [vmem:[#allocation5 + $0x1a8] sm:$0xff] }
  0x84   : > { %1042 = vmatpush3.bf16.msra.mxu1 %v1039_v63  ;;  %v364_v36 = vld [vmem:[#allocation5 + $0x1b8] sm:$0xff]  ;;  %v361_v39 = vld [vmem:[#allocation5 + $0x1a0] sm:$0xff]  ;;  %v363_v40 = vld [vmem:[#allocation5 + $0x1b0] sm:$0xff] }
  0x85   : > { %990 = vmatpush1.bf16.msra.mxu0 %v989_v37  ;;  %1044 = vmatprep.subr.bf16.mxu1 %v1043_v8  ;;  %v1017_v37 = vpack.c.bf16 %v359_v33, %v357_v32  ;;  %v366_v41 = vld [vmem:[#allocation5 + $0x1c8] sm:$0xff]  ;;  %v368_v42 = vld [vmem:[#allocation5 + $0x1d8] sm:$0xff]  ;;  %v1021_v43 = vpack.c.bf16 %v363_v40, %v361_v39  ;;  %v367_v46 = vld [vmem:[#allocation5 + $0x1d0] sm:$0xff] }
  0x86   : > { %992 = vmatprep.subr.bf16.mxu0 %v991_v38  ;;  %v1019_v38 = vpack.c.bf16 %v364_v36, %v362_v35  ;;  %v1023_v44 = vpack.c.bf16 %v368_v42, %v366_v41  ;;  %v370_v47 = vld [vmem:[#allocation5 + $0x1e8] sm:$0xff]  ;;  %v372_v48 = vld [vmem:[#allocation5 + $0x1f8] sm:$0xff]  ;;  %v369_v51 = vld [vmem:[#allocation5 + $0x1e0] sm:$0xff] }
  0x87   : > { %v1027_v50 = vpack.c.bf16 %v372_v48, %v370_v47  ;;  %v371_v52 = vld [vmem:[#allocation5 + $0x1f0] sm:$0xff]  ;;  %v301_v54 = vld [vmem:[%s1593_s7] sm:$0xff]  ;;  %v304_v55 = vld [vmem:[%s1593_s7 + $0x18] sm:$0xff] }
  0x88   : > { %1046 = vmatpush3.bf16.msra.mxu1 %v1043_v8  ;;  %v1029_v53 = vpack.c.bf16 %v371_v52, %v369_v51  ;;  %v303_v56 = vld [vmem:[%s1593_s7 + $0x10] sm:$0xff]  ;;  %v306_v57 = vld [vmem:[%s1593_s7 + $0x28] sm:$0xff]  ;;  %v477_v62 = vld [vmem:[#allocation7 + $0x78] sm:$0xff] }
  0x89   : > { %994 = vmatpush1.bf16.msra.mxu0 %v993_v45  ;;  %1048 = vmatprep.subr.bf16.mxu1 %v1047_v17  ;;  %v365_v45 = vld [vmem:[#allocation5 + $0x1c0] sm:$0xff]  ;;  %v307_v60 = vld [vmem:[%s1593_s7 + $0x30] sm:$0xff]  ;;  %v576_v1 = vld [vmem:[#allocation7 + $0x88] sm:$0xff] }
  0x8a   : > { %996 = vmatprep.subr.bf16.mxu0 %v995_v49  ;;  %v1025_v49 = vpack.c.bf16 %v367_v46, %v365_v45  ;;  %v476_v61 = vld [vmem:[#allocation7 + $0x70] sm:$0xff]  ;;  %v575_v0 = vld [vmem:[#allocation7 + $0x80] sm:$0xff]  ;;  %v578_v5 = vld [vmem:[#allocation7 + $0x98] sm:$0xff] }
  0x8b   : > { %v1059_v63 = vpack.c.bf16 %v477_v62, %v476_v61  ;;  %v1063_v2 = vpack.c.bf16 %v576_v1, %v575_v0  ;;  %v579_v9 = vld [vmem:[#allocation7 + $0xa0] sm:$0xff]  ;;  %v580_v10 = vld [vmem:[#allocation7 + $0xa8] sm:$0xff]  ;;  %v581_v14 = vld [vmem:[#allocation7 + $0xb0] sm:$0xff] }
  0x8c   : > { %1050 = vmatpush3.bf16.msra.mxu1 %v1047_v17  ;;  %v582_v15 = vld [vmem:[#allocation7 + $0xb8] sm:$0xff]  ;;  %v583_v19 = vld [vmem:[#allocation7 + $0xc0] sm:$0xff]  ;;  %v584_v20 = vld [vmem:[#allocation7 + $0xc8] sm:$0xff] }
  0x8d   : > { %998 = vmatpush1.bf16.msra.mxu0 %v997_v58  ;;  %1052 = vmatprep.subr.bf16.mxu1 %v1051_v26  ;;  %v305_v58 = vld [vmem:[%s1593_s7 + $0x20] sm:$0xff]  ;;  %v1075_v17 = vpack.c.bf16 %v582_v15, %v581_v14  ;;  %v585_v23 = vld [vmem:[#allocation7 + $0xd0] sm:$0xff]  ;;  %v586_v24 = vld [vmem:[#allocation7 + $0xd8] sm:$0xff] }
  0x8e   : > { %1000 = vmatprep.subr.bf16.mxu0 %v999_v59  ;;  %v308_v59 = vld [vmem:[%s1593_s7 + $0x38] sm:$0xff]  ;;  %v1083_v25 = vpack.c.bf16 %v586_v24, %v585_v23  ;;  %v588_v27 = vld [vmem:[#allocation7 + $0xe8] sm:$0xff]  ;;  %v589_v29 = vld [vmem:[#allocation7 + $0xf0] sm:$0xff] }
  0x8f   : > { %v839_v32 = vld [vmem:[%s1677_s3] ss:$0 sm:$0xff]  ;;  %v840_v41 = vld [vmem:[%s1677_s3 + $0x1] ss:$0 sm:$0xff] }
  0x90   : > { %1054 = vmatpush3.bf16.msra.mxu1 %v1051_v26  ;;  %v587_v26 = vld [vmem:[#allocation7 + $0xe0] sm:$0xff] }
  0x91   : > { %1002 = vmatpush1.bf16.msra.mxu0 %v1001_v3  ;;  %1056 = vmatprep.subr.bf16.mxu1 %v1055_v34  ;;  %v1087_v28 = vpack.c.bf16 %v588_v27, %v587_v26 }
  0x92   : > { %1004 = vmatprep.subr.bf16.mxu0 %v1003_v4  ;;  %v577_v4 = vld [vmem:[#allocation7 + $0x90] sm:$0xff] }
  0x93   : > { %v1067_v7 = vpack.c.bf16 %v578_v5, %v577_v4 }
  0x94   : > { %1058 = vmatpush3.bf16.msra.mxu1 %v1055_v34 }
  0x95   : > { %1006 = vmatpush1.bf16.msra.mxu0 %v1005_v12  ;;  %1060 = vmatprep.subr.bf16.mxu1 %v1059_v63  ;;  %v1071_v12 = vpack.c.bf16 %v580_v10, %v579_v9 }
  0x96   : > { %1008 = vmatprep.subr.bf16.mxu0 %v1007_v13 }
  0x98   : > { %1062 = vmatpush3.bf16.msra.mxu1 %v1059_v63 }
  0x99   : > { %1010 = vmatpush1.bf16.msra.mxu0 %v1009_v21  ;;  %1064 = vmatprep.subr.bf16.mxu1 %v1063_v2 }
  0x9a   : > { %1012 = vmatprep.subr.bf16.mxu0 %v1011_v22  ;;  %v1079_v22 = vpack.c.bf16 %v584_v20, %v583_v19 }
  0x9d   : > { %1014 = vmatpush1.bf16.msra.mxu0 %v1013_v30  ;;  %v590_v30 = vld [vmem:[#allocation7 + $0xf8] sm:$0xff] }
  0x9e   : > { %1016 = vmatprep.subr.bf16.mxu0 %v1015_v31  ;;  %v1091_v31 = vpack.c.bf16 %v590_v30, %v589_v29 }
  0xa1   : > { %1018 = vmatpush1.bf16.msra.mxu0 %v1017_v37 }
  0xa2   : > { %1020 = vmatprep.subr.bf16.mxu0 %v1019_v38 }
  0xa5   : > { %1022 = vmatpush1.bf16.msra.mxu0 %v1021_v43 }
  0xa6   : > { %1024 = vmatprep.subr.bf16.mxu0 %v1023_v44 }
  0xa9   : > { %1026 = vmatpush1.bf16.msra.mxu0 %v1025_v49 }
  0xaa   : > { %1028 = vmatprep.subr.bf16.mxu0 %v1027_v50 }
  0xad   : > { %1030 = vmatpush1.bf16.msra.mxu0 %v1029_v53 }
  0xb0   : > { %438 = vmatmul.mubr.f32.vlgmr.msra.gmra.mrb[0].mxu0 %v301_v54 }
  0xb1   : > { %443 = vmatprep.mubr.f32.mxu0 %v304_v55 }
  0xb4   : > { %444 = vmatmul.mubr.f32.gmra.mrb[2].mxu0 %v303_v56 }
  0xb5   : > { %449 = vmatprep.mubr.f32.mxu0 %v306_v57 }
  0xb8   : > { %450 = vmatmul.mubr.f32.gmra.mrb[4].mxu0 %v305_v58 }
  0xb9   : > { %455 = vmatprep.mubr.f32.mxu0 %v308_v59 }
  0xbc   : > { %456 = vmatmul.mubr.f32.gmra.mrb[6].mxu0 %v307_v60 }
 0x183   : > { %v439_v3 = vpop.f32.mrb[0].mxu0 }
 0x184   : > { %v441_v6 = vpop.f32.mrb[1].mxu0  ;;  %923 = vmatprep.mubr.f32.mxu1 %v439_v3 }
 0x187   : > { %v445_v8 = vpop.f32.mrb[2].mxu0 }
 0x188   : > { %v447_v11 = vpop.f32.mrb[3].mxu0  ;;  %924 = vmatmul.mubr.f32.vlgmr.msra.gmra.mrb[0].mxu1 %v445_v8 }
 0x189   : > { %1066 = vmatpush3.bf16.msra.mxu1 %v1063_v2 }
 0x18a   : > { %1068 = vmatprep.subr.bf16.mxu1 %v1067_v7 }
 0x18b   : > { %v451_v13 = vpop.f32.mrb[4].mxu0 }
 0x18c   : > { %v453_v16 = vpop.f32.mrb[5].mxu0  ;;  %926 = vmatprep.mubr.f32.mxu1 %v451_v13 }
 0x18d   : > { %1070 = vmatpush3.bf16.msra.mxu1 %v1067_v7 }
 0x18e   : > { %1072 = vmatprep.subr.bf16.mxu1 %v1071_v12 }
 0x18f   : > { %v457_v18 = vpop.f32.mrb[6].mxu0 }
 0x190   : > { %927 = vmatmul.mubr.f32.gmra.mrb[2].mxu1 %v457_v18  ;;  %v459_v21 = vpop.f32.mrb[7].mxu0 }
 0x191   : > { %1074 = vmatpush3.bf16.msra.mxu1 %v1071_v12  ;;  %961 = vmatprep.mubr.f32.mxu1 %v441_v6 }
 0x192   : > { %1076 = vmatprep.subr.bf16.mxu1 %v1075_v17 }
 0x195   : > { %1078 = vmatpush3.bf16.msra.mxu1 %v1075_v17 }
 0x196   : > { %1080 = vmatprep.subr.bf16.mxu1 %v1079_v22 }
 0x199   : > { %1082 = vmatpush3.bf16.msra.mxu1 %v1079_v22 }
 0x19a   : > { %1084 = vmatprep.subr.bf16.mxu1 %v1083_v25 }
 0x19d   : > { %1086 = vmatpush3.bf16.msra.mxu1 %v1083_v25 }
 0x19e   : > { %1088 = vmatprep.subr.bf16.mxu1 %v1087_v28 }
 0x1a1   : > { %1090 = vmatpush3.bf16.msra.mxu1 %v1087_v28 }
 0x1a2   : > { %1092 = vmatprep.subr.bf16.mxu1 %v1091_v31 }
 0x1a5   : > { %1094 = vmatpush3.bf16.msra.mxu1 %v1091_v31 }
 0x1a8   : > { %962 = vmatmul.mubr.f32.vlgmr.msra.gmra.mrb[4].mxu1 %v447_v11 }
 0x1a9   : > { %964 = vmatprep.mubr.f32.mxu1 %v453_v16 }
 0x1ac   : > { %965 = vmatmul.mubr.f32.gmra.mrb[6].mxu1 %v459_v21 }
 0x25b   : > { %v925_v33 = vpop.f32.mrb[0].mxu1 }
 0x25c   : > { %v557_v34 = vadd.f32 %v925_v33, %v839_v32  ;;  %v551_v35 = vpop.f32.mrb[1].mxu1 }
 0x25d   : > { %v552_v36 = vadd.f32 %v839_v32, %v551_v35 }
 0x25e   : > { %571 = vst [vmem:[%s290_s27 + $0x10] sm:$0xff] %v557_v34 }
 0x25f   : > { %570 = vst [vmem:[%s290_s27] sm:$0xff] %v552_v36 }
 0x263   : > { %v928_v37 = vpop.f32.mrb[2].mxu1 }
 0x264   : > { %v567_v38 = vadd.f32 %v928_v37, %v839_v32  ;;  %v561_v39 = vpop.f32.mrb[3].mxu1 }
 0x265   : > { %v562_v40 = vadd.f32 %v839_v32, %v561_v39 }
 0x266   : > { %573 = vst [vmem:[%s290_s27 + $0x30] sm:$0xff] %v567_v38 }
 0x267   : > { %572 = vst [vmem:[%s290_s27 + $0x20] sm:$0xff] %v562_v40 }
 0x27b   : > { %v963_v42 = vpop.f32.mrb[4].mxu1 }
 0x27c   : > { %v670_v43 = vadd.f32 %v963_v42, %v840_v41  ;;  %v664_v44 = vpop.f32.mrb[5].mxu1 }
 0x27d   : > { %v665_v45 = vadd.f32 %v840_v41, %v664_v44 }
 0x27e   : > { %684 = vst [vmem:[%s290_s27 + $0x18] sm:$0xff] %v670_v43 }
 0x27f   : > { %683 = vst [vmem:[%s290_s27 + $0x8] sm:$0xff] %v665_v45  ;;  %v966_v46 = vpop.f32.mrb[6].mxu1 }
 0x280   : > { %v680_v47 = vadd.f32 %v966_v46, %v840_v41  ;;  %v674_v48 = vpop.f32.mrb[7].mxu1 }
 0x281   : > { %v675_v49 = vadd.f32 %v840_v41, %v674_v48 }
 0x282   : > { %686 = vst [vmem:[%s290_s27 + $0x38] sm:$0xff] %v680_v47 }
 0x283   : > { %685 = vst [vmem:[%s290_s27 + $0x28] sm:$0xff] %v675_v49 }
 0x284   : > { %1283 = shalt.err (!%p1280_p11)
}
 0x285   : > { %s1284_s7 = scalar_lea.hbm %s1625_s6, 1024  ;;  %s1288_s27 = scalar_lea.hbm %s1678_s4, 2048 }
 0x286   : > { %p1285_p0 = scmp.ne.s32.totalorder %s1625_s6, %s1284_s7  ;;  %p1289_p6 = scmp.lt.u32.totalorder %s1625_s6, %s1678_s4 }
 0x287   : > { %p1290_p7 = scmp.lt.u32.totalorder %s1288_s27, %s1284_s7  ;;  %p1292_p8 = scmp.lt.u32.totalorder %s1284_s7, %s1625_s6 }
 0x288   : > { %p1286_p4 = pnand %p1285_p0, %p1693_p12 }
 0x289   : > { %p1291_p2 = por %p1290_p7, %p1289_p6 }
 0x28a   : > { %p1287_p13 = pneg %p1286_p4 }
 0x28b   : > { %p1293_p1 = por %p1292_p8, %p1291_p2 }
 0x28d   : > { %p1294_p10 = pnand %p1293_p1, %p1287_p13 }
 0x28f   : > { %1297 = shalt.err (!%p1294_p10)
}
 0x290   : > { %s1366_s5 = smov 256   ;;  %s1367_s9 = smov 16  }
 0x291   : > { %1105 = dma.vmem_to_hbm [thread:$0]  (%p1693_p12), %s1620_s28, 1024, %s1625_s6, %s688_s12, %s1366_s5, %s1366_s5, %s1367_s9  }
 0x292 PF: > { %s719_s11 = sand.u32 1, %s1336_s15   ;;  %p1694_p3 = scmp.ne.s32.totalorder %s1686_s26, 0 }
 0x293   : > { %p1695_p5 = scmp.ge.s32.totalorder %s1356_s20, 2  ;;  %s720_s18 = scalar_lea.sflag [#allocation4], %s719_s11 }
 0x295   : > { %p1119_p9 = pnand %p1695_p5, %p1694_p3 }
 0x297   : > { %1331 = dma.done.wait (!%p1119_p9), %s720_s18, 1024  }
 0x298   : > { %1333 = vsyncadd (!%p1119_p9), %s720_s18, 4294966272  ;;  %s21_s20 = sadd.s32 1, %s1356_s20   ;;  %s1696_s15 = smov %s1340_s16 }
 0x299   : > { %p18_p11 = scmp.ge.s32.totalorder %s21_s20, 4   ;;  %s1697_s16 = smov %s1344_s17 }
 0x29a   : > { %s1698_s17 = smov %s1538_s13  ;;  %s1699_s18 = smov %s1352_s19 }
 0x29b   : > { %s1700_s19 = smov %s1702_s8  ;;  %20 = sbr.rel (!%p18_p11) target bundleno = 7 (0x7), region = 95 }
 0x2a2   :  { %725 = vsyncpa [#allocation3], 1 }
 0x2a3   :  { %727 = vsyncpa [#allocation3 + $0x1], 1 }
 0x2a4   :  { %728 = vsyncpa [#allocation6], 1 }
 0x2a5   :  { %729 = vsyncpa [#allocation4], 1 }
 0x2a6   :  { %731 = vsyncpa [#allocation4 + $0x1], 1 }

</bundles_post_ra>
